<compile_context>
chip_gen: v5e
topology: v5e:2x2
jax: 0.10.0
libtpu: 0.0.40
codegen_flags: <defaults>
</compile_context>

<pallas_src>
import math

import jax
import jax.numpy as jnp
from jax.experimental import pallas as pl
from jax.experimental.pallas import tpu as pltpu


_LANE = 128          # lane width: last dim padded to a multiple of this
_SUBLANE = 8         # sublane width: second-to-last dim multiple
_MAX_TILE_ROWS = 256 # M tile cap: fills v6e/v7x MXU, 2x v5e's 128x128 MXU


def _round_up(x, m):
    return (x + m - 1) // m * m


def _gelu_exact(x):
    # PyTorch nn.GELU() default: exact erf formulation (f32 elementwise).
    return 0.5 * x * (1.0 + jax.lax.erf(x * jnp.float32(0.7071067811865476)))


# ----------------------------------------------------------------------------
# fused kernel: all layers of the MLP in one invocation
# refs = (x_ref, w0_ref, b0_ref, [w1_ref, b1_ref, ...], o_ref)
# ----------------------------------------------------------------------------
def _make_mlp_kernel(n_layers):
    def kernel(*refs):
        x_ref = refs[0]
        o_ref = refs[-1]
        h = x_ref[...]                                      # bf16 (TR, D0p)
        for l in range(n_layers):                           # static unroll
            w = refs[1 + 2 * l][...]                        # bf16 (Dlp, Dl1p)
            b = refs[2 + 2 * l][...]                        # f32  (1,   Dl1p)
            y = jnp.dot(h, w, preferred_element_type=jnp.float32) + b
            y = _gelu_exact(y)                              # BN already folded
            # keep the next GEMM input in bf16; final layer stays f32
            h = y.astype(jnp.bfloat16) if l + 1 < n_layers else y
        o_ref[...] = h.astype(o_ref.dtype)
    return kernel


def _const_spec(shape):
    """BlockSpec for a block that is identical at every grid step."""
    if hasattr(pl, "Buffered"):
        return pl.BlockSpec(shape, lambda i: (0, 0), pipeline_mode=pl.Buffered(1))
    return pl.BlockSpec(shape, lambda i: (0, 0))


# ----------------------------------------------------------------------------
# wrapper: fold BN, pad to lane-dense shapes, single pallas_call
# ----------------------------------------------------------------------------
def projection_mlp_forward(x, layers_params):
    """x: (N, in_dim) float32.  layers_params: list of dicts per Linear+BN block
    with keys w (in,out), b (out,), bn_g, bn_b, bn_rm, bn_rv (out,)."""
    N, in_dim = x.shape

    # Fold eval-mode BatchNorm1d into each Linear (exact, eps = 1e-5).
    # TODO(synk): nn.Dropout is the identity here (p=0 / inference) — omitted.
    folded = []
    for p in layers_params:
        scale = p["bn_g"] * jax.lax.rsqrt(p["bn_rv"] + 1e-5)        # (out,)
        w_f = (p["w"] * scale[None, :]).astype(jnp.bfloat16)        # MXU dtype
        b_f = ((p["b"] - p["bn_rm"]) * scale + p["bn_b"]).astype(jnp.float32)
        folded.append((w_f, b_f))

    dims = [in_dim] + [w.shape[1] for w, _ in folded]
    dims_p = [_round_up(d, _LANE) for d in dims]                    # lane-dense

    # batch-adaptive row tiling: one grid step for small N, big tiles for big N
    tile_rows = min(_round_up(max(N, 1), _SUBLANE), _MAX_TILE_ROWS)
    N_p = _round_up(N, tile_rows)
    grid_m = N_p // tile_rows

    # zero-pad: padded input features hit zero weight rows, padded output
    # features have zero columns + zero bias -> real outputs untouched.
    x_p = jnp.pad(x.astype(jnp.bfloat16),
                  ((0, N_p - N), (0, dims_p[0] - dims[0])))

    args = [x_p]
    in_specs = [pl.BlockSpec((tile_rows, dims_p[0]), lambda i: (i, 0))]
    vmem_bytes = 2 * tile_rows * dims_p[0] * 2          # bf16 x, double-buffered
    for l, (w_f, b_f) in enumerate(folded):
        din, dout = dims[l], dims[l + 1]
        din_p, dout_p = dims_p[l], dims_p[l + 1]
        w_p = jnp.pad(w_f, ((0, din_p - din), (0, dout_p - dout)))
        b_p = jnp.pad(b_f.reshape(1, -1), ((0, 0), (0, dout_p - dout)))
        args += [w_p, b_p]
        in_specs += [_const_spec((din_p, dout_p)),       # single-buffered weight
                     _const_spec((1, dout_p))]           # single-buffered bias
        vmem_bytes += din_p * dout_p * 2 + dout_p * 4
    vmem_bytes += 2 * tile_rows * dims_p[-1] * 4         # f32 out, double-buffered
    # explicit scoped-VMEM budget (v5e default ~16 MiB is too small for wide
    # layers); clamp at v7x's 64 MiB physical per-TC VMEM.
    vmem_limit = int(min(max(32 << 20, 2 * vmem_bytes + (8 << 20)), 64 << 20))

    out_p = pl.pallas_call(
        _make_mlp_kernel(len(folded)),
        out_shape=jax.ShapeDtypeStruct((N_p, dims_p[-1]), jnp.float32),
        grid=(grid_m,),
        in_specs=in_specs,
        out_specs=pl.BlockSpec((tile_rows, dims_p[-1]), lambda i: (i, 0)),
        compiler_params=pltpu.CompilerParams(
            dimension_semantics=("parallel",),
            vmem_limit_bytes=vmem_limit),
    )(*args)

    return out_p[:N, :dims[-1]]


# ----------------------------------------------------------------------------
# pure-JAX reference (unfused, unfolded, f32) for correctness checking
# ----------------------------------------------------------------------------
def projection_mlp_reference(x, layers_params):
    h = x.astype(jnp.float32)
    for p in layers_params:
        y = h @ p["w"] + p["b"]
        y = (y - p["bn_rm"]) * jax.lax.rsqrt(p["bn_rv"] + 1e-5)
        y = y * p["bn_g"] + p["bn_b"]
        h = _gelu_exact(y)
    return h


# ----------------------------------------------------------------------------
# parameter construction mirroring the module constructor
# ----------------------------------------------------------------------------
def build_params(key, in_dim, out_dim, layer=1):
    if layer == 2:
        dims = [out_dim // 2, out_dim] if in_dim < out_dim else [in_dim // 2, out_dim]
    else:
        dims = [out_dim]
    params = []
    d = in_dim
    ki = iter(jax.random.split(key, 6 * len(dims)))
    for to_dim in dims:
        bound = 1.0 / math.sqrt(d)
        params.append({
            # torch Linear weight is (out, in); stored transposed as (in, out)
            "w": jax.random.uniform(next(ki), (d, to_dim), jnp.float32,
                                    -bound, bound),
            "b": jax.random.uniform(next(ki), (to_dim,), jnp.float32,
                                    -bound, bound),
            # BatchNorm1d affine params + running stats (eval mode)
            "bn_g": 1.0 + 0.1 * jax.random.normal(next(ki), (to_dim,), jnp.float32),
            "bn_b": 0.1 * jax.random.normal(next(ki), (to_dim,), jnp.float32),
            "bn_rm": 0.1 * jax.random.normal(next(ki), (to_dim,), jnp.float32),
            "bn_rv": jnp.abs(1.0 + 0.1 * jax.random.normal(next(ki), (to_dim,),
                                                           jnp.float32)),
        })
        d = to_dim
    return params


# ----------------------------------------------------------------------------
if __name__ == "__main__":
    # Small shapes consistent with the module: batch=16, in_dim=32, out_dim=64.
    N, in_dim, out_dim = 16, 32, 64
    root = jax.random.PRNGKey(0)
    kx, k1, k2 = jax.random.split(root, 3)
    x = jax.random.normal(kx, (N, in_dim), dtype=jnp.float32)

    for layer, kp in ((1, k1), (2, k2)):      # exercise both constructor paths
        params = build_params(kp, in_dim, out_dim, layer=layer)
        out = projection_mlp_forward(x, params)
        out = jax.block_until_ready(out)
        ref = projection_mlp_reference(x, params)
        assert out.shape == (N, out_dim), out.shape
        assert bool(jnp.all(jnp.isfinite(out)))
        # bf16 MXU inputs vs f32 reference -> relaxed tolerance
        assert bool(jnp.allclose(out, ref, atol=2e-2, rtol=2e-2)), \
            float(jnp.max(jnp.abs(out - ref)))

    print("KERNEL_OK")
</pallas_src>

<mosaic_0001>
module attributes {stable_mosaic.version = 11 : i64} {
  func.func @kernel(%arg0: i32, %arg1: memref<16x128xbf16, #tpu.memory_space<vmem>>, %arg2: memref<128x128xbf16, #tpu.memory_space<vmem>>, %arg3: memref<1x128xf32, #tpu.memory_space<vmem>>, %arg4: memref<16x128xf32, #tpu.memory_space<vmem>>) attributes {dimension_semantics = [#tpu.dimension_semantics<parallel>], iteration_bounds = array<i64: 1>, scalar_prefetch = 0 : i64, scratch_operands = 0 : i64, tpu.core_type = #tpu.core_type<tc>, window_params = [{transform_indices = @transform_0, window_bounds = array<i64: 16, 128>}, {pipeline_mode = #tpu.pipeline_mode<synchronous>, transform_indices = @transform_1, window_bounds = array<i64: 128, 128>}, {pipeline_mode = #tpu.pipeline_mode<synchronous>, transform_indices = @transform_2, window_bounds = array<i64: 1, 128>}, {transform_indices = @transform_3, window_bounds = array<i64: 16, 128>}]} {
    %c0 = arith.constant 0 : index
    %c0_0 = arith.constant 0 : index
    %0 = vector.load %arg1[%c0, %c0_0] : memref<16x128xbf16, #tpu.memory_space<vmem>>, vector<16x128xbf16>
    %c0_1 = arith.constant 0 : index
    %c0_2 = arith.constant 0 : index
    %1 = vector.load %arg2[%c0_1, %c0_2] : memref<128x128xbf16, #tpu.memory_space<vmem>>, vector<128x128xbf16>
    %c0_3 = arith.constant 0 : index
    %c0_4 = arith.constant 0 : index
    %2 = vector.load %arg3[%c0_3, %c0_4] : memref<1x128xf32, #tpu.memory_space<vmem>>, vector<1x128xf32>
    %cst = arith.constant dense<0.000000e+00> : vector<16x128xf32>
    %3 = tpu.matmul %0, %1, %cst {dimension_numbers = #tpu.dot_dimension_numbers<[1], [0], [0], [1], [0, 0, 1, 1], [], []>} : vector<16x128xbf16>, vector<128x128xbf16>, vector<16x128xf32> -> vector<16x128xf32>
    %4 = vector.broadcast %2 : vector<1x128xf32> to vector<16x128xf32>
    %5 = arith.addf %3, %4 : vector<16x128xf32>
    %cst_5 = arith.constant 5.000000e-01 : f32
    %6 = vector.broadcast %cst_5 : f32 to vector<16x128xf32>
    %7 = arith.mulf %6, %5 : vector<16x128xf32>
    %cst_6 = arith.constant 0.707106769 : f32
    %8 = vector.broadcast %cst_6 : f32 to vector<16x128xf32>
    %9 = arith.mulf %5, %8 : vector<16x128xf32>
    %10 = math.erf %9 : vector<16x128xf32>
    %cst_7 = arith.constant 1.000000e+00 : f32
    %11 = vector.broadcast %cst_7 : f32 to vector<16x128xf32>
    %12 = arith.addf %11, %10 : vector<16x128xf32>
    %13 = arith.mulf %7, %12 : vector<16x128xf32>
    %c0_8 = arith.constant 0 : index
    %c0_9 = arith.constant 0 : index
    %14 = vector.load %arg4[%c0_8, %c0_9] : memref<16x128xf32, #tpu.memory_space<vmem>>, vector<16x128xf32>
    tpu.vector_store %arg4[%c0_8, %c0_9], %13 {strides = array<i32>} : memref<16x128xf32, #tpu.memory_space<vmem>>, vector<16x128xf32>,
    return
  }
  func.func @transform_0(%arg0: i32) -> (i32, i32) {
    %c0_i32 = arith.constant 0 : i32
    %c0_i32_0 = arith.constant 0 : i32
    return %arg0, %c0_i32 : i32, i32
  }
  func.func @transform_1(%arg0: i32) -> (i32, i32) {
    %c0_i32 = arith.constant 0 : i32
    %c0_i32_0 = arith.constant 0 : i32
    %c0_i32_1 = arith.constant 0 : i32
    return %c0_i32, %c0_i32_0 : i32, i32
  }
  func.func @transform_2(%arg0: i32) -> (i32, i32) {
    %c0_i32 = arith.constant 0 : i32
    %c0_i32_0 = arith.constant 0 : i32
    %c0_i32_1 = arith.constant 0 : i32
    return %c0_i32, %c0_i32_0 : i32, i32
  }
  func.func @transform_3(%arg0: i32) -> (i32, i32) {
    %c0_i32 = arith.constant 0 : i32
    %c0_i32_0 = arith.constant 0 : i32
    return %arg0, %c0_i32 : i32, i32
  }
}

</mosaic_0001>

<bundles_post_ra>
// kernel: tpu_custom_call.1
= control target key start
LH: loop header
LB: loop body
LE: loop exit
PB: predicated region body
PF: predicated region fallthrough
CT: control target
= control target key end

     0   :  { %8 = vsyncpa [#allocation3], 0  ;;  %s436_s0 = inlined_call_operand.hbm [shape: bf16[16,128], index: 0, kind: input, shape index: {}]   ;;  %s437_s1 = inlined_call_operand.hbm [shape: bf16[128,128], index: 1, kind: input, shape index: {}]   ;;  %s438_s2 = inlined_call_operand.vmem [shape: f32[1,128], index: 2, kind: input, shape index: {}]   ;;  %s439_s3 = inlined_call_operand.hbm [shape: f32[16,128], index: 3, kind: output, shape index: {}]  }
   0x1   :  { %9 = vsyncpa [#allocation6], 0 }
   0x2   :  { %10 = vsyncpa [#allocation4], 0  ;;  %s15_s14 = sshll.u32 %s436_s0, 4  ;;  %s384_s15 = smov [#allocation2]   ;;  %s16_s14 = int_to_ptr.hbm [resolvable:$true] %s15_s14 }
   0x3   :  { %s17_s16 = sshll.u32 %s384_s15, 4  ;;  %s28_s19 = sshll.u32 %s437_s1, 4  ;;  %s18_s16 = int_to_ptr.vmem [resolvable:$true] %s17_s16  ;;  %s29_s19 = int_to_ptr.hbm [resolvable:$true] %s28_s19 }
   0x4   :  { %s385_s20 = smov 64   ;;  %s386_s21 = smov 4  }
   0x5   :  { %23 = dma.hbm_to_vmem [thread:$0]  %s16_s14, 128, %s18_s16, [#allocation3], %s385_s20, %s385_s20, %s386_s21  }
   0x6   :  { %s387_s22 = smov [#allocation5]  }
   0x7   :  { %s30_s23 = sshll.u32 %s387_s22, 4  ;;  %s31_s23 = int_to_ptr.vmem [resolvable:$true] %s30_s23 }
   0x8   :  { %36 = dma.hbm_to_vmem [thread:$0]  %s29_s19, 1024, %s31_s23, [#allocation6], %s385_s20, %s385_s20, %s386_s21  }
   0x9   :  { %378 = dma.done.wait [#allocation3], 128  }
   0xa   :  { %379 = vsyncadd [#allocation3], 4294967168 }
   0xb   :  { %380 = dma.done.wait [#allocation6], 1024  }
   0xc   :  { %381 = vsyncadd [#allocation6], 4294966272  ;;  %v293_v0 = vld [vmem:[#allocation5 + $0x38] sm:$0xff]  ;;  %v292_v1 = vld [vmem:[#allocation5 + $0x30] sm:$0xff]  ;;  %s233_s27 = sshll.u32 %s439_s3, 4  ;;  %s389_s28 = smov 128   ;;  %s234_s27 = int_to_ptr.hbm [resolvable:$true] %s233_s27 }
   0xd   :  { %123 = vmatpush.bf16.msra.mxu0 %v293_v0  ;;  %v291_v2 = vld [vmem:[#allocation5 + $0x28] sm:$0xff]  ;;  %v290_v3 = vld [vmem:[#allocation5 + $0x20] sm:$0xff]  ;;  %v289_v4 = vld [vmem:[#allocation5 + $0x18] sm:$0xff]  ;;  %s390_s29 = smov 8  }
   0xe   :  { %v288_v5 = vld [vmem:[#allocation5 + $0x10] sm:$0xff]  ;;  %v287_v6 = vld [vmem:[#allocation5 + $0x8] sm:$0xff]  ;;  %v286_v7 = vld [vmem:[#allocation5] sm:$0xff] }
   0xf   :  { %v285_v8 = vld [vmem:[#allocation2] sm:$0xff] }
  0x10   :  { %v301_v9 = vld [vmem:[%s438_s2] ss:$0 sm:$0xff]  ;;  %s388_s2 = smov [#allocation7]  }
  0x11   :  { %124 = vmatpush.bf16.msra.mxu0 %v292_v1  ;;  %s231_s24 = sshll.u32 %s388_s2, 4  ;;  %s232_s24 = int_to_ptr.vmem [resolvable:$true] %s231_s24 }
  0x15   :  { %125 = vmatpush.bf16.msra.mxu0 %v291_v2 }
  0x19   :  { %126 = vmatpush.bf16.msra.mxu0 %v290_v3 }
  0x1d   :  { %127 = vmatpush.bf16.msra.mxu0 %v289_v4 }
  0x21   :  { %128 = vmatpush.bf16.msra.mxu0 %v288_v5 }
  0x25   :  { %129 = vmatpush.bf16.msra.mxu0 %v287_v6 }
  0x29   :  { %130 = vmatpush.bf16.msra.mxu0 %v286_v7 }
  0x2c   :  { %131 = vmatmul.bf16.vlgmr.msra.gmra.mxu0 %v285_v8 }
  0xa9   :  { %v132_v10 = vpop.f32.mrf.mxu0 }
  0xaa   :  { %v420_v11 = vadd.f32 %v301_v9, %v132_v10 }
  0xac   :  { %v139_v12 = vmul.f32 0.70710677, %v420_v11 }
  0xae   :  { %v141_v13 = vmul.f32 %v139_v12, %v139_v12 }
  0xb0   :  { %v142_v14 = vmin.f32 %v141_v13, 16.0 }
  0xb1   :  { %v134_v15 = vpop.f32.mrf.mxu0 }
  0xb2   :  { %v143_v16 = vmul.f32 2.1237322e-06, %v142_v14  ;;  %v154_v17 = vmul.f32 3.8918573e-05, %v142_v14  ;;  %v423_v18 = vadd.f32 %v301_v9, %v134_v15 }
  0xb4   :  { %v144_v19 = vadd.f32 0.00028619796, %v143_v16  ;;  %v155_v20 = vadd.f32 0.001143296, %v154_v17  ;;  %v426_v21 = vmul.f32 0.70710677, %v423_v18 }
  0xb5   :  { %v137_v17 = vmul.f32 0.5, %v420_v11  ;;  %v138_v11 = vmul.f32 0.5, %v423_v18 }
  0xb6   :  { %v145_v22 = vmul.f32 %v144_v19, %v142_v14  ;;  %v156_v23 = vmul.f32 %v155_v20, %v142_v14  ;;  %v181_v24 = vmul.f32 %v426_v21, %v426_v21 }
  0xb8   :  { %v157_v25 = vadd.f32 0.014752088, %v156_v23  ;;  %v146_v26 = vadd.f32 0.0036580483, %v145_v22  ;;  %v182_v27 = vmin.f32 %v181_v24, 16.0 }
  0xba   :  { %v158_v28 = vmul.f32 %v157_v25, %v142_v14  ;;  %v183_v29 = vmul.f32 2.1237322e-06, %v182_v27  ;;  %v194_v30 = vmul.f32 3.8918573e-05, %v182_v27  ;;  %v147_v32 = vmul.f32 %v146_v26, %v142_v14 }
  0xbc   :  { %v159_v31 = vadd.f32 0.112945676, %v158_v28  ;;  %v184_v33 = vadd.f32 0.00028619796, %v183_v29  ;;  %v195_v34 = vadd.f32 0.001143296, %v194_v30 }
  0xbd   :  { %v148_v39 = vadd.f32 0.05243302, %v147_v32 }
  0xbe   :  { %v160_v35 = vmul.f32 %v159_v31, %v142_v14  ;;  %v185_v36 = vmul.f32 %v184_v33, %v182_v27  ;;  %v196_v37 = vmul.f32 %v195_v34, %v182_v27 }
  0xbf   :  { %v149_v45 = vmul.f32 %v148_v39, %v142_v14 }
  0xc0   :  { %v161_v38 = vadd.f32 0.4994258, %v160_v35  ;;  %v197_v40 = vadd.f32 0.014752088, %v196_v37  ;;  %v186_v42 = vadd.f32 0.0036580483, %v185_v36 }
  0xc1   :  { %v150_v49 = vadd.f32 0.18741608, %v149_v45 }
  0xc2   :  { %v162_v41 = vmul.f32 %v161_v38, %v142_v14  ;;  %v198_v43 = vmul.f32 %v197_v40, %v182_v27  ;;  %v187_v47 = vmul.f32 %v186_v42, %v182_v27 }
  0xc3   :  { %v151_v54 = vmul.f32 %v150_v49, %v142_v14 }
  0xc4   :  { %v163_v44 = vadd.f32 1.0, %v162_v41  ;;  %v199_v46 = vadd.f32 0.112945676, %v198_v43  ;;  %v188_v51 = vadd.f32 0.05243302, %v187_v47 }
  0xc5   :  { %v152_v60 = vadd.f32 1.1283791, %v151_v54 }
  0xc6   :  { %302 = vrcp.f32 %v163_v44  ;;  %v200_v48 = vmul.f32 %v199_v46, %v182_v27  ;;  %v189_v57 = vmul.f32 %v188_v51, %v182_v27  ;;  %v175_v59 = vand.u32 2147483648, %v163_v44 }
  0xc7   :  { %v173_v62 = vand.u32 2147483647, %v163_v44  ;;  %vm169_vm1 = vweird.f32 %v163_v44  ;;  %v153_v3 = vmul.f32 %v152_v60, %v139_v12 }
  0xc8   :  { %v201_v50 = vadd.f32 0.4994258, %v200_v48  ;;  %v190_v63 = vadd.f32 0.18741608, %v189_v57  ;;  %v176_v1 = vor.u32 1.1754944e-38, %v175_v59 }
  0xc9   :  { %vm174_vm3 = vcmp.eq.f32.partialorder %v173_v62, 8.507059e+37 }
  0xca   :  { %v202_v52 = vmul.f32 %v201_v50, %v182_v27  ;;  %v191_v6 = vmul.f32 %v190_v63, %v182_v27 }
  0xcc   :  { %v303_v53 = vpop.eup %302  ;;  %v203_v56 = vadd.f32 1.0, %v202_v52  ;;  %v192_v14 = vadd.f32 1.1283791, %v191_v6 }
  0xcd   :  { %v165_v55 = vmul.f32 %v303_v53, %v163_v44  ;;  %vm170_vm0 = vweird.f32 %v303_v53 }
  0xce   :  { %304 = vrcp.f32 %v203_v56  ;;  %vm171_vm2 = vmor %vm169_vm1, %vm170_vm0  ;;  %v215_v13 = vand.u32 2147483648, %v203_v56  ;;  %v213_v16 = vand.u32 2147483647, %v203_v56  ;;  %vm209_vm5 = vweird.f32 %v203_v56 }
  0xcf   :  { %v166_v58 = vsub.f32 1.0, %v165_v55  ;;  %v193_v23 = vmul.f32 %v192_v14, %v426_v21 }
  0xd0   :  { %v216_v12 = vor.u32 1.1754944e-38, %v215_v13  ;;  %vm214_vm7 = vcmp.eq.f32.partialorder %v213_v16, 8.507059e+37 }
  0xd1   :  { %v167_v61 = vmul.f32 %v303_v53, %v166_v58 }
  0xd3   :  { %v168_v0 = vadd.f32 %v303_v53, %v167_v61 }
  0xd4   :  { %v305_v2 = vpop.eup %304 }
  0xd5   :  { %v172_v4 = vsel %vm171_vm2, %v303_v53, %v168_v0  ;;  %v205_v7 = vmul.f32 %v305_v2, %v203_v56  ;;  %vm210_vm4 = vweird.f32 %v305_v2 }
  0xd6   :  { %v177_v5 = vsel %vm174_vm3, %v176_v1, %v172_v4  ;;  %vm211_vm6 = vmor %vm209_vm5, %vm210_vm4 }
  0xd7   :  { %v178_v8 = vmul.f32 %v177_v5, %v153_v3  ;;  %v206_v9 = vsub.f32 1.0, %v205_v7 }
  0xd9   :  { %v283_v10 = vclamps-f32 %v178_v8, 1.0  ;;  %v207_v15 = vmul.f32 %v305_v2, %v206_v9 }
  0xdb   :  { %v221_v19 = vadd.f32 1.0, %v283_v10  ;;  %v208_v20 = vadd.f32 %v305_v2, %v207_v15 }
  0xdd   :  { %v223_v22 = vmul.f32 %v221_v19, %v137_v17  ;;  %v212_v24 = vsel %vm211_vm6, %v305_v2, %v208_v20 }
  0xde   :  { %v217_v25 = vsel %vm214_vm7, %v216_v12, %v212_v24 }
  0xdf   :  { %225 = vst [vmem:[#allocation7] sm:$0xff] %v223_v22  ;;  %v218_v26 = vmul.f32 %v217_v25, %v193_v23 }
  0xe1   :  { %v284_v27 = vclamps-f32 %v218_v26, 1.0 }
  0xe3   :  { %v222_v28 = vadd.f32 1.0, %v284_v27 }
  0xe5   :  { %v224_v29 = vmul.f32 %v222_v28, %v138_v11 }
  0xe7   :  { %226 = vst [vmem:[#allocation7 + $0x8] sm:$0xff] %v224_v29 }
  0xe8   :  { %239 = dma.vmem_to_hbm [thread:$0]  %s232_s24, 256, %s234_s27, [#allocation4], %s389_s28, %s389_s28, %s390_s29  }
  0xe9   :  { %382 = dma.done.wait [#allocation4], 256  }
  0xea   :  { %383 = vsyncadd [#allocation4], 4294967040 }
  0xeb   :  { %244 = vsyncpa [#allocation3], 1 }
  0xec   :  { %245 = vsyncpa [#allocation6], 1 }
  0xed   :  { %246 = vsyncpa [#allocation4], 1 }

</bundles_post_ra>
